<compile_context>
chip_gen: v7x
topology: tpu7x:2x2x1
jax: 0.10.0
libtpu: 0.0.40
codegen_flags: <defaults>
</compile_context>

<pallas_src>
import functools

import jax
import jax.numpy as jnp
from jax.experimental import pallas as pl
from jax.experimental.pallas import tpu as pltpu


def _round_up(x: int, m: int) -> int:
    return (x + m - 1) // m * m


def _qnet_kernel(x_ref, w1_ref, b1_ref, w2_ref, b2_ref, o_ref):
    # Layer 1: bf16 operands -> MXU, f32 accumulation.
    h = jnp.dot(x_ref[...], w1_ref[...], preferred_element_type=jnp.float32)
    # Bias + ReLU in f32 (v5e has no bf16 VPU; f32 elementwise is safe everywhere).
    h = jnp.maximum(h + b1_ref[...], 0.0)
    # Layer 2: cast activations to bf16 for the MXU, accumulate in f32.
    y = jnp.dot(h.astype(jnp.bfloat16), w2_ref[...],
                preferred_element_type=jnp.float32)
    o_ref[...] = (y + b2_ref[...]).astype(o_ref.dtype)


@functools.partial(jax.jit, static_argnames=("tile_m",))
def linear_qnet_forward(x, w1, b1, w2, b2, *, tile_m=128):
    """x: [B, I], w1: [I, H], b1: [H] or [1, H], w2: [H, O], b2: [O] or [1, O].

    Returns [B, O] float32. Matches nn.Linear convention with weights stored as
    [in_features, out_features] (i.e. W = weight.T from PyTorch).
    """
    B, I = x.shape
    H = w1.shape[1]
    O = w2.shape[1]

    # Pad every lane / contraction dim to 128 and the batch to the MXU row tile.
    Ip = _round_up(I, 128)
    Hp = _round_up(H, 128)
    Op = _round_up(O, 128)
    Bp = _round_up(B, tile_m)

    xp = jnp.pad(x.astype(jnp.float32), ((0, Bp - B), (0, Ip - I))).astype(jnp.bfloat16)
    w1p = jnp.pad(w1.astype(jnp.float32), ((0, Ip - I), (0, Hp - H))).astype(jnp.bfloat16)
    b1p = jnp.pad(b1.reshape(1, H).astype(jnp.float32), ((0, 0), (0, Hp - H)))
    w2p = jnp.pad(w2.astype(jnp.float32), ((0, Hp - H), (0, Op - O))).astype(jnp.bfloat16)
    b2p = jnp.pad(b2.reshape(1, O).astype(jnp.float32), ((0, 0), (0, Op - O)))

    grid = (Bp // tile_m,)

    out = pl.pallas_call(
        _qnet_kernel,
        out_shape=jax.ShapeDtypeStruct((Bp, Op), jnp.float32),
        grid_spec=pltpu.PrefetchScalarGridSpec(
            num_scalar_prefetch=0,
            grid=grid,
            in_specs=[
                pl.BlockSpec((tile_m, Ip), lambda i: (i, 0)),  # x: tiled over batch
                pl.BlockSpec((Ip, Hp), lambda i: (0, 0)),      # W1: VMEM-resident
                pl.BlockSpec((1, Hp), lambda i: (0, 0)),       # b1: VMEM-resident
                pl.BlockSpec((Hp, Op), lambda i: (0, 0)),      # W2: VMEM-resident
                pl.BlockSpec((1, Op), lambda i: (0, 0)),       # b2: VMEM-resident
            ],
            out_specs=pl.BlockSpec((tile_m, Op), lambda i: (i, 0)),
        ),
        compiler_params=pltpu.CompilerParams(
            dimension_semantics=("parallel",),  # batch tiles are independent
        ),
    )(xp, w1p, b1p, w2p, b2p)

    # Slice the lane-dense / row-padded slab back to the logical output.
    return out[:B, :O]


def reference_forward(x, w1, b1, w2, b2):
    h = jnp.maximum(x @ w1 + b1.reshape(1, -1), 0.0)
    return h @ w2 + b2.reshape(1, -1)


if __name__ == "__main__":
    # Small shapes consistent with Linear_QNet: Linear(I->H) -> ReLU -> Linear(H->O).
    batch, input_size, hidden_size, output_size = 8, 16, 32, 4

    key = jax.random.PRNGKey(0)
    kx, kw1, kb1, kw2, kb2, kx2 = jax.random.split(key, 6)

    x = jax.random.normal(kx, (batch, input_size), dtype=jnp.float32)

    # Deterministic parameter init (uniform, PyTorch-like scale).
    lim1 = 1.0 / (input_size ** 0.5)
    lim2 = 1.0 / (hidden_size ** 0.5)
    w1 = jax.random.uniform(kw1, (input_size, hidden_size), jnp.float32, -lim1, lim1)
    b1 = jax.random.uniform(kb1, (hidden_size,), jnp.float32, -lim1, lim1)
    w2 = jax.random.uniform(kw2, (hidden_size, output_size), jnp.float32, -lim2, lim2)
    b2 = jax.random.uniform(kb2, (output_size,), jnp.float32, -lim2, lim2)

    # Single tiny batch (one grid step after padding).
    out = jax.block_until_ready(linear_qnet_forward(x, w1, b1, w2, b2))
    ref = reference_forward(x, w1, b1, w2, b2)
    assert out.shape == (batch, output_size)
    assert jnp.allclose(out, ref, atol=2e-2, rtol=2e-2), float(jnp.max(jnp.abs(out - ref)))

    # Larger (replay-batch style) case: exercises multiple grid steps + row padding.
    big_batch = 300
    xb = jax.random.normal(kx2, (big_batch, input_size), dtype=jnp.float32)
    out_b = jax.block_until_ready(linear_qnet_forward(xb, w1, b1, w2, b2))
    ref_b = reference_forward(xb, w1, b1, w2, b2)
    assert out_b.shape == (big_batch, output_size)
    assert jnp.allclose(out_b, ref_b, atol=2e-2, rtol=2e-2), float(jnp.max(jnp.abs(out_b - ref_b)))

    print("KERNEL_OK")
</pallas_src>

<mosaic_0001>
module attributes {stable_mosaic.version = 11 : i64} {
  func.func @_qnet_kernel(%arg0: i32, %arg1: memref<128x128xbf16, #tpu.memory_space<vmem>>, %arg2: memref<128x128xbf16, #tpu.memory_space<vmem>>, %arg3: memref<1x128xf32, #tpu.memory_space<vmem>>, %arg4: memref<128x128xbf16, #tpu.memory_space<vmem>>, %arg5: memref<1x128xf32, #tpu.memory_space<vmem>>, %arg6: memref<128x128xf32, #tpu.memory_space<vmem>>) attributes {dimension_semantics = [#tpu.dimension_semantics<parallel>], iteration_bounds = array<i64: 1>, scalar_prefetch = 0 : i64, scratch_operands = 0 : i64, tpu.core_type = #tpu.core_type<tc>, window_params = [{transform_indices = @transform_0, window_bounds = array<i64: 128, 128>}, {pipeline_mode = #tpu.pipeline_mode<synchronous>, transform_indices = @transform_1, window_bounds = array<i64: 128, 128>}, {pipeline_mode = #tpu.pipeline_mode<synchronous>, transform_indices = @transform_2, window_bounds = array<i64: 1, 128>}, {pipeline_mode = #tpu.pipeline_mode<synchronous>, transform_indices = @transform_3, window_bounds = array<i64: 128, 128>}, {pipeline_mode = #tpu.pipeline_mode<synchronous>, transform_indices = @transform_4, window_bounds = array<i64: 1, 128>}, {transform_indices = @transform_5, window_bounds = array<i64: 128, 128>}]} {
    %c0 = arith.constant 0 : index
    %c0_0 = arith.constant 0 : index
    %0 = vector.load %arg1[%c0, %c0_0] : memref<128x128xbf16, #tpu.memory_space<vmem>>, vector<128x128xbf16>
    %c0_1 = arith.constant 0 : index
    %c0_2 = arith.constant 0 : index
    %1 = vector.load %arg2[%c0_1, %c0_2] : memref<128x128xbf16, #tpu.memory_space<vmem>>, vector<128x128xbf16>
    %cst = arith.constant dense<0.000000e+00> : vector<128x128xf32>
    %2 = tpu.matmul %0, %1, %cst {dimension_numbers = #tpu.dot_dimension_numbers<[1], [0], [0], [1], [0, 0, 1, 1], [], []>} : vector<128x128xbf16>, vector<128x128xbf16>, vector<128x128xf32> -> vector<128x128xf32>
    %c0_3 = arith.constant 0 : index
    %c0_4 = arith.constant 0 : index
    %3 = vector.load %arg3[%c0_3, %c0_4] : memref<1x128xf32, #tpu.memory_space<vmem>>, vector<1x128xf32>
    %4 = vector.broadcast %3 : vector<1x128xf32> to vector<128x128xf32>
    %5 = arith.addf %2, %4 : vector<128x128xf32>
    %cst_5 = arith.constant 0.000000e+00 : f32
    %6 = vector.broadcast %cst_5 : f32 to vector<128x128xf32>
    %7 = arith.maximumf %5, %6 : vector<128x128xf32>
    %8 = arith.truncf %7 : vector<128x128xf32> to vector<128x128xbf16>
    %c0_6 = arith.constant 0 : index
    %c0_7 = arith.constant 0 : index
    %9 = vector.load %arg4[%c0_6, %c0_7] : memref<128x128xbf16, #tpu.memory_space<vmem>>, vector<128x128xbf16>
    %cst_8 = arith.constant dense<0.000000e+00> : vector<128x128xf32>
    %10 = tpu.matmul %8, %9, %cst_8 {dimension_numbers = #tpu.dot_dimension_numbers<[1], [0], [0], [1], [0, 0, 1, 1], [], []>} : vector<128x128xbf16>, vector<128x128xbf16>, vector<128x128xf32> -> vector<128x128xf32>
    %c0_9 = arith.constant 0 : index
    %c0_10 = arith.constant 0 : index
    %11 = vector.load %arg5[%c0_9, %c0_10] : memref<1x128xf32, #tpu.memory_space<vmem>>, vector<1x128xf32>
    %12 = vector.broadcast %11 : vector<1x128xf32> to vector<128x128xf32>
    %13 = arith.addf %10, %12 : vector<128x128xf32>
    %c0_11 = arith.constant 0 : index
    %c0_12 = arith.constant 0 : index
    %14 = vector.load %arg6[%c0_11, %c0_12] : memref<128x128xf32, #tpu.memory_space<vmem>>, vector<128x128xf32>
    tpu.vector_store %arg6[%c0_11, %c0_12], %13 {strides = array<i32>} : memref<128x128xf32, #tpu.memory_space<vmem>>, vector<128x128xf32>,
    return
  }
  func.func @transform_0(%arg0: i32) -> (i32, i32) {
    %c0_i32 = arith.constant 0 : i32
    %c0_i32_0 = arith.constant 0 : i32
    return %arg0, %c0_i32 : i32, i32
  }
  func.func @transform_1(%arg0: i32) -> (i32, i32) {
    %c0_i32 = arith.constant 0 : i32
    %c0_i32_0 = arith.constant 0 : i32
    %c0_i32_1 = arith.constant 0 : i32
    return %c0_i32, %c0_i32_0 : i32, i32
  }
  func.func @transform_2(%arg0: i32) -> (i32, i32) {
    %c0_i32 = arith.constant 0 : i32
    %c0_i32_0 = arith.constant 0 : i32
    %c0_i32_1 = arith.constant 0 : i32
    return %c0_i32, %c0_i32_0 : i32, i32
  }
  func.func @transform_3(%arg0: i32) -> (i32, i32) {
    %c0_i32 = arith.constant 0 : i32
    %c0_i32_0 = arith.constant 0 : i32
    %c0_i32_1 = arith.constant 0 : i32
    return %c0_i32, %c0_i32_0 : i32, i32
  }
  func.func @transform_4(%arg0: i32) -> (i32, i32) {
    %c0_i32 = arith.constant 0 : i32
    %c0_i32_0 = arith.constant 0 : i32
    %c0_i32_1 = arith.constant 0 : i32
    return %c0_i32, %c0_i32_0 : i32, i32
  }
  func.func @transform_5(%arg0: i32) -> (i32, i32) {
    %c0_i32 = arith.constant 0 : i32
    %c0_i32_0 = arith.constant 0 : i32
    return %arg0, %c0_i32 : i32, i32
  }
}

</mosaic_0001>

<bundles_post_ra>
// kernel: linear_qnet_forward.1
= control target key start
LH: loop header
LB: loop body
LE: loop exit
PB: predicated region body
PF: predicated region fallthrough
CT: control target
= control target key end

     0   :  { %s767_s1 = inlined_call_operand.vmem [shape: bf16[128,128], index: 1, kind: input, shape index: {}]   ;;  %s768_s0 = inlined_call_operand.vmem [shape: bf16[128,128], index: 0, kind: input, shape index: {}]   ;;  %s769_s3 = inlined_call_operand.vmem [shape: bf16[128,128], index: 3, kind: input, shape index: {}]   ;;  %s770_s2 = inlined_call_operand.vmem [shape: f32[1,128], index: 2, kind: input, shape index: {}]   ;;  %s771_s4 = inlined_call_operand.vmem [shape: f32[1,128], index: 4, kind: input, shape index: {}]   ;;  %s772_s5 = inlined_call_operand.vmem [shape: f32[128,128], index: 5, kind: output, shape index: {}]  }
   0x1   :  { %v587_v0 = vld [vmem:[%s767_s1] sm:$0xff]   ;;  %v588_v1 = vld [vmem:[%s767_s1 + $0x8] sm:$0xff]   ;;  %v589_v2 = vld [vmem:[%s767_s1 + $0x10] sm:$0xff]  }
   0x2   :  { %523 = vmatprep.subr.bf16.mxu0 %v587_v0  ;;  %v590_v3 = vld [vmem:[%s767_s1 + $0x18] sm:$0xff]   ;;  %v595_v4 = vld [vmem:[%s768_s0] sm:$0xff]   ;;  %v592_v6 = vld [vmem:[%s767_s1 + $0x28] sm:$0xff]  }
   0x3   :  { %524 = vmatpush3.bf16.msra.mxu0 %v587_v0  ;;  %539 = vmatprep.mubr.bf16.mxu0 %v595_v4  ;;  %v591_v5 = vld [vmem:[%s767_s1 + $0x20] sm:$0xff]   ;;  %v604_v8 = vld [vmem:[%s769_s3 + $0x8] sm:$0xff]   ;;  %v593_v9 = vld [vmem:[%s767_s1 + $0x30] sm:$0xff]  }
   0x4   :  { %525 = vmatprep.subr.bf16.mxu0 %v588_v1  ;;  %v603_v7 = vld [vmem:[%s769_s3] sm:$0xff]   ;;  %v605_v10 = vld [vmem:[%s769_s3 + $0x10] sm:$0xff]   ;;  %v594_v11 = vld [vmem:[%s767_s1 + $0x38] sm:$0xff]  }
   0x5   :  { %555 = vmatprep.subr.bf16.mxu1 %v603_v7  ;;  %v606_v12 = vld [vmem:[%s769_s3 + $0x18] sm:$0xff]   ;;  %v607_v13 = vld [vmem:[%s769_s3 + $0x20] sm:$0xff]   ;;  %v596_v14 = vld [vmem:[%s768_s0 + $0x8] sm:$0xff]  }
   0x6   :  { %556 = vmatpush3.bf16.msra.mxu1 %v603_v7  ;;  %v597_v15 = vld [vmem:[%s768_s0 + $0x10] sm:$0xff]   ;;  %v608_v16 = vld [vmem:[%s769_s3 + $0x28] sm:$0xff]   ;;  %v598_v17 = vld [vmem:[%s768_s0 + $0x18] sm:$0xff]  }
   0x7   :  { %526 = vmatpush3.bf16.msra.mxu0 %v588_v1  ;;  %557 = vmatprep.subr.bf16.mxu1 %v604_v8  ;;  %v599_v18 = vld [vmem:[%s768_s0 + $0x20] sm:$0xff]   ;;  %v600_v19 = vld [vmem:[%s768_s0 + $0x28] sm:$0xff]   ;;  %v601_v20 = vld [vmem:[%s768_s0 + $0x30] sm:$0xff]  }
   0x8   :  { %527 = vmatprep.subr.bf16.mxu0 %v589_v2  ;;  %v602_v21 = vld [vmem:[%s768_s0 + $0x38] sm:$0xff]   ;;  %v609_v22 = vld [vmem:[%s769_s3 + $0x30] sm:$0xff]   ;;  %v465_v24 = vld [vmem:[%s770_s2] ss:$0 sm:$0xff] }
   0x9   :  { %v610_v23 = vld [vmem:[%s769_s3 + $0x38] sm:$0xff]  }
   0xa   :  { %558 = vmatpush3.bf16.msra.mxu1 %v604_v8 }
   0xb   :  { %528 = vmatpush3.bf16.msra.mxu0 %v589_v2  ;;  %559 = vmatprep.subr.bf16.mxu1 %v605_v10 }
   0xc   :  { %529 = vmatprep.subr.bf16.mxu0 %v590_v3 }
   0xe   :  { %560 = vmatpush3.bf16.msra.mxu1 %v605_v10 }
   0xf   :  { %530 = vmatpush3.bf16.msra.mxu0 %v590_v3  ;;  %561 = vmatprep.subr.bf16.mxu1 %v606_v12 }
  0x10   :  { %531 = vmatprep.subr.bf16.mxu0 %v591_v5 }
  0x12   :  { %562 = vmatpush3.bf16.msra.mxu1 %v606_v12 }
  0x13   :  { %532 = vmatpush3.bf16.msra.mxu0 %v591_v5  ;;  %563 = vmatprep.subr.bf16.mxu1 %v607_v13 }
  0x14   :  { %533 = vmatprep.subr.bf16.mxu0 %v592_v6 }
  0x16   :  { %564 = vmatpush3.bf16.msra.mxu1 %v607_v13 }
  0x17   :  { %534 = vmatpush3.bf16.msra.mxu0 %v592_v6  ;;  %565 = vmatprep.subr.bf16.mxu1 %v608_v16 }
  0x18   :  { %535 = vmatprep.subr.bf16.mxu0 %v593_v9 }
  0x1a   :  { %566 = vmatpush3.bf16.msra.mxu1 %v608_v16 }
  0x1b   :  { %536 = vmatpush3.bf16.msra.mxu0 %v593_v9  ;;  %567 = vmatprep.subr.bf16.mxu1 %v609_v22 }
  0x1c   :  { %537 = vmatprep.subr.bf16.mxu0 %v594_v11 }
  0x1e   :  { %568 = vmatpush3.bf16.msra.mxu1 %v609_v22 }
  0x1f   :  { %538 = vmatpush3.bf16.msra.mxu0 %v594_v11  ;;  %569 = vmatprep.subr.bf16.mxu1 %v610_v23 }
  0x22   :  { %540 = vmatmul.mubr.bf16.vlgmr.msra.gmra.mrb[0].mxu0 %v596_v14  ;;  %570 = vmatpush3.bf16.msra.mxu1 %v610_v23 }
  0x23   :  { %543 = vmatprep.mubr.bf16.mxu0 %v597_v15 }
  0x2a   :  { %544 = vmatmul.mubr.bf16.gmra.mrb[4].mxu0 %v598_v17  ;;  %v482_v17 = vld [vmem:[%s771_s4] ss:$0 sm:$0xff] }
  0x2b   :  { %547 = vmatprep.mubr.bf16.mxu0 %v599_v18 }
  0x32   :  { %548 = vmatmul.mubr.bf16.gmra.mrb[8].mxu0 %v600_v19 }
  0x33   :  { %551 = vmatprep.mubr.bf16.mxu0 %v601_v20 }
  0x3a   :  { %552 = vmatmul.mubr.bf16.gmra.mrb[12].mxu0 %v602_v21 }
  0xf5   :  { %v541_v25 = vpop.f32.mrb[0].mxu0 }
  0xf6   :  { %v199_v26 = vadd.f32 %v541_v25, %v465_v24  ;;  %v190_v27 = vpop.f32.mrb[1].mxu0 }
  0xf7   :  { %v191_v28 = vadd.f32 %v465_v24, %v190_v27  ;;  %v542_v29 = vpop.f32.mrb[2].mxu0 }
  0xf8   :  { %v202_v30 = vadd.f32 %v542_v29, %v465_v24  ;;  %v193_v31 = vpop.f32.mrb[3].mxu0  ;;  %v255_v33 = vmax.f32 %v199_v26, 0.0 }
  0xf9   :  { %v194_v32 = vadd.f32 %v465_v24, %v193_v31  ;;  %v253_v35 = vmax.f32 %v191_v28, 0.0 }
  0xfa   :  { %v256_v34 = vmax.f32 %v202_v30, 0.0 }
  0xfb   :  { %v254_v36 = vmax.f32 %v194_v32, 0.0 }
  0xfc   :  { %v270_v37 = vpack.c.bf16 %v256_v34, %v255_v33 }
  0xfd   :  { %v545_v38 = vpop.f32.mrb[4].mxu0  ;;  %v269_v39 = vpack.c.bf16 %v254_v36, %v253_v35 }
  0xfe   :  { %v215_v40 = vadd.f32 %v545_v38, %v465_v24  ;;  %v206_v41 = vpop.f32.mrb[5].mxu0 }
  0xff   :  { %v207_v42 = vadd.f32 %v465_v24, %v206_v41  ;;  %v546_v43 = vpop.f32.mrb[6].mxu0  ;;  %571 = vmatprep.mubr.bf16.mxu1 %v269_v39 }
 0x100   :  { %v218_v44 = vadd.f32 %v546_v43, %v465_v24  ;;  %v209_v45 = vpop.f32.mrb[7].mxu0  ;;  %572 = vmatmul.mubr.bf16.vlgmr.msra.gmra.mrb[0].mxu1 %v270_v37  ;;  %v259_v47 = vmax.f32 %v215_v40, 0.0 }
 0x101   :  { %v210_v46 = vadd.f32 %v465_v24, %v209_v45  ;;  %v257_v49 = vmax.f32 %v207_v42, 0.0 }
 0x102   :  { %v260_v48 = vmax.f32 %v218_v44, 0.0 }
 0x103   :  { %v258_v50 = vmax.f32 %v210_v46, 0.0 }
 0x104   :  { %v272_v51 = vpack.c.bf16 %v260_v48, %v259_v47 }
 0x105   :  { %v271_v52 = vpack.c.bf16 %v258_v50, %v257_v49  ;;  %v549_v53 = vpop.f32.mrb[8].mxu0 }
 0x106   :  { %v231_v54 = vadd.f32 %v549_v53, %v465_v24  ;;  %v222_v55 = vpop.f32.mrb[9].mxu0 }
 0x107   :  { %v223_v56 = vadd.f32 %v465_v24, %v222_v55  ;;  %v550_v57 = vpop.f32.mrb[10].mxu0  ;;  %575 = vmatprep.mubr.bf16.mxu1 %v271_v52 }
 0x108   :  { %v234_v58 = vadd.f32 %v550_v57, %v465_v24  ;;  %v225_v59 = vpop.f32.mrb[11].mxu0  ;;  %576 = vmatmul.mubr.bf16.gmra.mrb[4].mxu1 %v272_v51  ;;  %v263_v61 = vmax.f32 %v231_v54, 0.0 }
 0x109   :  { %v226_v60 = vadd.f32 %v465_v24, %v225_v59  ;;  %v261_v63 = vmax.f32 %v223_v56, 0.0 }
 0x10a   :  { %v264_v62 = vmax.f32 %v234_v58, 0.0 }
 0x10b   :  { %v262_v0 = vmax.f32 %v226_v60, 0.0 }
 0x10c   :  { %v274_v1 = vpack.c.bf16 %v264_v62, %v263_v61 }
 0x10d   :  { %v273_v2 = vpack.c.bf16 %v262_v0, %v261_v63  ;;  %v553_v3 = vpop.f32.mrb[12].mxu0 }
 0x10e   :  { %v247_v4 = vadd.f32 %v553_v3, %v465_v24  ;;  %v238_v5 = vpop.f32.mrb[13].mxu0 }
 0x10f   :  { %v239_v6 = vadd.f32 %v465_v24, %v238_v5  ;;  %v554_v7 = vpop.f32.mrb[14].mxu0  ;;  %579 = vmatprep.mubr.bf16.mxu1 %v273_v2 }
 0x110   :  { %v250_v8 = vadd.f32 %v554_v7, %v465_v24  ;;  %v241_v9 = vpop.f32.mrb[15].mxu0  ;;  %580 = vmatmul.mubr.bf16.gmra.mrb[8].mxu1 %v274_v1  ;;  %v267_v11 = vmax.f32 %v247_v4, 0.0 }
 0x111   :  { %v242_v10 = vadd.f32 %v465_v24, %v241_v9  ;;  %v265_v13 = vmax.f32 %v239_v6, 0.0 }
 0x112   :  { %v268_v12 = vmax.f32 %v250_v8, 0.0 }
 0x113   :  { %v266_v14 = vmax.f32 %v242_v10, 0.0 }
 0x114   :  { %v276_v15 = vpack.c.bf16 %v268_v12, %v267_v11 }
 0x115   :  { %v275_v16 = vpack.c.bf16 %v266_v14, %v265_v13 }
 0x117   :  { %583 = vmatprep.mubr.bf16.mxu1 %v275_v16 }
 0x118   :  { %584 = vmatmul.mubr.bf16.gmra.mrb[12].mxu1 %v276_v15 }
 0x1d3   :  { %v573_v18 = vpop.f32.mrb[0].mxu1 }
 0x1d4   :  { %v391_v19 = vadd.f32 %v573_v18, %v482_v17  ;;  %v382_v20 = vpop.f32.mrb[1].mxu1 }
 0x1d5   :  { %v383_v21 = vadd.f32 %v482_v17, %v382_v20  ;;  %v574_v22 = vpop.f32.mrb[2].mxu1 }
 0x1d6   :  { %447 = vst [vmem:[%s772_s5 + $0x10] sm:$0xff] %v391_v19  ;;  %v394_v23 = vadd.f32 %v574_v22, %v482_v17  ;;  %v385_v24 = vpop.f32.mrb[3].mxu1 }
 0x1d7   :  { %445 = vst [vmem:[%s772_s5] sm:$0xff] %v383_v21  ;;  %v386_v25 = vadd.f32 %v482_v17, %v385_v24 }
 0x1d8   :  { %448 = vst [vmem:[%s772_s5 + $0x18] sm:$0xff] %v394_v23 }
 0x1d9   :  { %446 = vst [vmem:[%s772_s5 + $0x8] sm:$0xff] %v386_v25 }
 0x1db   :  { %v577_v26 = vpop.f32.mrb[4].mxu1 }
 0x1dc   :  { %v407_v27 = vadd.f32 %v577_v26, %v482_v17  ;;  %v398_v28 = vpop.f32.mrb[5].mxu1 }
 0x1dd   :  { %v399_v29 = vadd.f32 %v482_v17, %v398_v28  ;;  %v578_v30 = vpop.f32.mrb[6].mxu1 }
 0x1de   :  { %451 = vst [vmem:[%s772_s5 + $0x30] sm:$0xff] %v407_v27  ;;  %v410_v31 = vadd.f32 %v578_v30, %v482_v17  ;;  %v401_v32 = vpop.f32.mrb[7].mxu1 }
 0x1df   :  { %449 = vst [vmem:[%s772_s5 + $0x20] sm:$0xff] %v399_v29  ;;  %v402_v33 = vadd.f32 %v482_v17, %v401_v32 }
 0x1e0   :  { %452 = vst [vmem:[%s772_s5 + $0x38] sm:$0xff] %v410_v31 }
 0x1e1   :  { %450 = vst [vmem:[%s772_s5 + $0x28] sm:$0xff] %v402_v33 }
 0x1e3   :  { %v581_v34 = vpop.f32.mrb[8].mxu1 }
 0x1e4   :  { %v423_v35 = vadd.f32 %v581_v34, %v482_v17  ;;  %v414_v36 = vpop.f32.mrb[9].mxu1 }
 0x1e5   :  { %v415_v37 = vadd.f32 %v482_v17, %v414_v36  ;;  %v582_v38 = vpop.f32.mrb[10].mxu1 }
 0x1e6   :  { %455 = vst [vmem:[%s772_s5 + $0x50] sm:$0xff] %v423_v35  ;;  %v426_v39 = vadd.f32 %v582_v38, %v482_v17  ;;  %v417_v40 = vpop.f32.mrb[11].mxu1 }
 0x1e7   :  { %453 = vst [vmem:[%s772_s5 + $0x40] sm:$0xff] %v415_v37  ;;  %v418_v41 = vadd.f32 %v482_v17, %v417_v40 }
 0x1e8   :  { %456 = vst [vmem:[%s772_s5 + $0x58] sm:$0xff] %v426_v39 }
 0x1e9   :  { %454 = vst [vmem:[%s772_s5 + $0x48] sm:$0xff] %v418_v41 }
 0x1eb   :  { %v585_v42 = vpop.f32.mrb[12].mxu1 }
 0x1ec   :  { %v439_v43 = vadd.f32 %v585_v42, %v482_v17  ;;  %v430_v44 = vpop.f32.mrb[13].mxu1 }
 0x1ed   :  { %v431_v45 = vadd.f32 %v482_v17, %v430_v44  ;;  %v586_v46 = vpop.f32.mrb[14].mxu1 }
 0x1ee   :  { %459 = vst [vmem:[%s772_s5 + $0x70] sm:$0xff] %v439_v43  ;;  %v442_v47 = vadd.f32 %v586_v46, %v482_v17  ;;  %v433_v48 = vpop.f32.mrb[15].mxu1 }
 0x1ef   :  { %457 = vst [vmem:[%s772_s5 + $0x60] sm:$0xff] %v431_v45  ;;  %v434_v49 = vadd.f32 %v482_v17, %v433_v48 }
 0x1f0   :  { %460 = vst [vmem:[%s772_s5 + $0x78] sm:$0xff] %v442_v47 }
 0x1f1   :  { %458 = vst [vmem:[%s772_s5 + $0x68] sm:$0xff] %v434_v49 }

</bundles_post_ra>
